<compile_context>
chip_gen: v7x
topology: tpu7x:2x2x1
jax: 0.10.0
libtpu: 0.0.40
codegen_flags: <defaults>
</compile_context>

<pallas_src>
import jax
import jax.numpy as jnp
from jax.experimental import pallas as pl
from jax.experimental.pallas import tpu as pltpu


def _ta_kernel(cls_ref, cc_ref, mask_ref,
               wg2_ref, bg2_ref, aw1t_ref, ab_ref, bwt_ref,
               out_ref):
    # Static block shapes: cls (TB*S, c_in), cc (TB, cc_dim), mask (TB*S, 1).
    tb = cc_ref.shape[0]
    rows = cls_ref.shape[0]
    s = rows // tb

    cls = cls_ref[...].astype(jnp.float32)           # (TB*S, c_in)
    m = mask_ref[...].astype(jnp.float32)            # (TB*S, 1)  widen on VPU
    cc = cc_ref[...].astype(jnp.float32)             # (TB, cc_dim)

    # Folded g-layer + second half of `a`:
    #   (m * g(cc)) @ aW2^T == m * (cc @ w_g2 + b_g2)
    t = jnp.dot(cc, wg2_ref[...],
                preferred_element_type=jnp.float32) + bg2_ref[...]   # (TB, mid)
    mid = t.shape[-1]
    # Repeat each batch row S times -> (TB*S, mid): sublane broadcast followed
    # by a leading-dim merge (lane dim untouched -> layout-trivial reshape).
    t_rows = jnp.broadcast_to(t[:, None, :], (tb, s, mid)).reshape(rows, mid)

    cls_m = cls * m                                   # VPU
    x = (jnp.dot(cls_m, aw1t_ref[...],                # MXU, M = TB*S rows
                 preferred_element_type=jnp.float32)
         + m * t_rows                                 # rank-1 VPU FMA
         + ab_ref[...])
    x = jnp.maximum(x, 0.0)

    y = jnp.dot(x, bwt_ref[...],                      # MXU
                preferred_element_type=jnp.float32) + 1.0
    out_ref[...] = y.astype(out_ref.dtype)


def _pick_block_batch(B, S, c_in, c_out, cc_dim, itemsize=4,
                      target_rows=256, vmem_budget=4 << 20):
    """Choose TB = batch elements per grid step.

    Targets M = TB*S ~ 256 matmul rows (>=128 for v5e's 128-wide MXU), keeps
    the double-buffered working set under a conservative budget that fits every
    generation's scoped-VMEM default (v5e 16 MiB, v6e/v7x 32 MiB; v7x physical
    VMEM is only 64 MiB), and keeps >=2 grid steps so v7x's 2 TensorCores both
    get work.
    """
    per_b = 2 * itemsize * (S * c_in + S * c_out + S + cc_dim)  # double-buffered
    tb = int(max(1, min(B,
                        max(1, target_rows // max(S, 1)),
                        max(1, vmem_budget // max(per_b, 1)))))
    while B % tb:
        tb -= 1
    # v7x megacore: keep at least 2 grid steps when the batch allows it.
    if B // tb < 2 and B > 1:
        divs = [d for d in range(1, B) if B % d == 0 and B // d >= 2]
        tb = max(divs) if divs else B
    # Block sublane dims must be multiples of 8 unless the block spans the
    # whole array; degrade gracefully to a single full-array block otherwise.
    if tb != B and tb % 8 != 0:
        cands = [d for d in range(8, B, 8) if B % d == 0 and d <= tb]
        tb = max(cands) if cands else B
    return tb


def ta_module_v1(cc_emb, cls_emb, v_mask, params):
    """concat=True forward of TaModuleV1 as a Pallas TPU kernel.

    cc_emb:  (B, cc_dim)
    cls_emb: (B, S, c_in)
    v_mask:  (B, S)
    returns: (B, S, c_out)
    """
    B, S, c_in = cls_emb.shape
    cc_dim = cc_emb.shape[1]
    mid_dim = params["a_w"].shape[0]
    c_out = params["b_w"].shape[0]
    hi = jax.lax.Precision.HIGHEST

    # --- one-time weight folding (tiny glue, done in XLA) -------------------
    a_w1t = params["a_w"][:, :c_in].T                      # (c_in, mid)
    a_w2t = params["a_w"][:, c_in:].T                      # (cc_dim, mid)
    w_g2 = jnp.dot(params["g_w"].T, a_w2t, precision=hi)   # (cc_dim, mid)
    b_g2 = jnp.dot(params["g_b"].reshape(1, cc_dim), a_w2t, precision=hi)  # (1, mid)
    a_b = params["a_b"].reshape(1, mid_dim)
    b_wt = params["b_w"].T                                  # (mid, c_out)

    # --- flatten batch*seq into matmul rows (free metadata reshapes) --------
    cls2 = cls_emb.reshape(B * S, c_in)
    mask2 = v_mask.reshape(B * S, 1)        # native dtype; cast inside kernel

    TB = _pick_block_batch(B, S, c_in, c_out, cc_dim,
                           itemsize=cls_emb.dtype.itemsize)
    TBS = TB * S
    grid = (B // TB,)

    out2 = pl.pallas_call(
        _ta_kernel,
        out_shape=jax.ShapeDtypeStruct((B * S, c_out), cls_emb.dtype),
        grid_spec=pltpu.PrefetchScalarGridSpec(
            num_scalar_prefetch=0,
            grid=grid,
            in_specs=[
                pl.BlockSpec((TBS, c_in), lambda i: (i, 0)),       # cls rows
                pl.BlockSpec((TB, cc_dim), lambda i: (i, 0)),      # cc_emb
                pl.BlockSpec((TBS, 1), lambda i: (i, 0)),          # mask rows
                pl.BlockSpec((cc_dim, mid_dim), lambda i: (0, 0)),  # w_g2
                pl.BlockSpec((1, mid_dim), lambda i: (0, 0)),       # b_g2
                pl.BlockSpec((c_in, mid_dim), lambda i: (0, 0)),    # a_w1t
                pl.BlockSpec((1, mid_dim), lambda i: (0, 0)),       # a_b
                pl.BlockSpec((mid_dim, c_out), lambda i: (0, 0)),   # b_wt
            ],
            # c_out is tiny: keeping the natural (rows, c_out) layout is cheaper
            # here than forcing a lane-dense slab (see header comment).
            out_specs=pl.BlockSpec((TBS, c_out), lambda i: (i, 0)),
        ),
        compiler_params=pltpu.CompilerParams(
            dimension_semantics=("parallel",)),
    )(cls2, cc_emb, mask2, w_g2, b_g2, a_w1t, a_b, b_wt)

    return out2.reshape(B, S, c_out)


def ta_module_v1_ref(cc_emb, cls_emb, v_mask, params):
    """Pure-JAX reference mirroring the PyTorch forward (concat=True)."""
    B, S, _ = cls_emb.shape
    hi = jax.lax.Precision.HIGHEST
    gcc = jnp.dot(cc_emb, params["g_w"].T, precision=hi) + params["g_b"]
    gcc_e = jnp.broadcast_to(gcc[:, None, :], (B, S, gcc.shape[-1]))
    cal = jnp.concatenate([cls_emb, gcc_e], axis=-1)
    cal = cal * v_mask[..., None].astype(cal.dtype)
    x = jnp.maximum(jnp.dot(cal, params["a_w"].T, precision=hi) + params["a_b"], 0.0)
    return jnp.dot(x, params["b_w"].T, precision=hi) + 1.0


def init_params(key, c_in, cc_dim, c_out, mid_dim):
    ks = jax.random.split(key, 4)
    in_a = c_in + cc_dim
    return {
        # nn.Linear-style uniform init, deterministic via PRNGKey
        "g_w": jax.random.uniform(ks[0], (cc_dim, cc_dim),
                                  minval=-1.0 / cc_dim ** 0.5,
                                  maxval=1.0 / cc_dim ** 0.5, dtype=jnp.float32),
        "g_b": jax.random.uniform(ks[1], (cc_dim,),
                                  minval=-1.0 / cc_dim ** 0.5,
                                  maxval=1.0 / cc_dim ** 0.5, dtype=jnp.float32),
        "a_w": jax.random.uniform(ks[2], (mid_dim, in_a),
                                  minval=-1.0 / in_a ** 0.5,
                                  maxval=1.0 / in_a ** 0.5, dtype=jnp.float32),
        "a_b": jax.random.uniform(ks[3], (mid_dim,),
                                  minval=-1.0 / in_a ** 0.5,
                                  maxval=1.0 / in_a ** 0.5, dtype=jnp.float32),
        # module does self.b.weight.data.zero_()
        "b_w": jnp.zeros((c_out, mid_dim), jnp.float32),
    }


if __name__ == "__main__":
    B, S = 64, 8                       # -> TB=32, grid=(2,), M=256 rows/step
    c_in, cc_dim, mid_dim, c_out = 32, 16, 32, 8

    key = jax.random.PRNGKey(0)
    k1, k2, k3, k4, k5 = jax.random.split(key, 5)
    cc_emb = jax.random.normal(k1, (B, cc_dim), jnp.float32)
    cls_emb = jax.random.normal(k2, (B, S, c_in), jnp.float32)
    v_mask = (jax.random.uniform(k3, (B, S)) > 0.3).astype(jnp.float32)
    params = init_params(k4, c_in, cc_dim, c_out, mid_dim)

    # The module zero-inits b.weight (output would be identically 1.0), which
    # makes an allclose check vacuous — use a nonzero b_w to exercise the full
    # g-fold / mask / a / relu / b chain.
    params_test = dict(params)
    params_test["b_w"] = jax.random.uniform(
        k5, (c_out, mid_dim), minval=-0.2, maxval=0.2, dtype=jnp.float32)

    out = ta_module_v1(cc_emb, cls_emb, v_mask, params_test)
    out = jax.block_until_ready(out)
    ref = ta_module_v1_ref(cc_emb, cls_emb, v_mask, params_test)
    assert out.shape == (B, S, c_out)
    # Tolerance covers MXU f32 multi-pass vs XLA HIGHEST accumulation-order
    # differences; structural errors would be O(0.1-1).
    assert jnp.allclose(out, ref, atol=2e-2, rtol=2e-2), \
        float(jnp.max(jnp.abs(out - ref)))

    # Faithful zero-init path (b.weight.data.zero_()) must give exactly 1.0.
    out0 = jax.block_until_ready(ta_module_v1(cc_emb, cls_emb, v_mask, params))
    assert jnp.allclose(out0, jnp.ones_like(out0), atol=1e-5)

    print("KERNEL_OK")
</pallas_src>

<mosaic_0001>
module attributes {stable_mosaic.version = 11 : i64} {
  func.func @_ta_kernel(%arg0: i32, %arg1: memref<256x32xf32, #tpu.memory_space<vmem>>, %arg2: memref<32x16xf32, #tpu.memory_space<vmem>>, %arg3: memref<256x1xf32, #tpu.memory_space<vmem>>, %arg4: memref<16x32xf32, #tpu.memory_space<vmem>>, %arg5: memref<1x32xf32, #tpu.memory_space<vmem>>, %arg6: memref<32x32xf32, #tpu.memory_space<vmem>>, %arg7: memref<1x32xf32, #tpu.memory_space<vmem>>, %arg8: memref<32x8xf32, #tpu.memory_space<vmem>>, %arg9: memref<256x8xf32, #tpu.memory_space<vmem>>) attributes {dimension_semantics = [#tpu.dimension_semantics<parallel>], iteration_bounds = array<i64: 2>, scalar_prefetch = 0 : i64, scratch_operands = 0 : i64, tpu.core_type = #tpu.core_type<tc>, window_params = [{transform_indices = @transform_0, window_bounds = array<i64: 256, 32>}, {transform_indices = @transform_1, window_bounds = array<i64: 32, 16>}, {transform_indices = @transform_2, window_bounds = array<i64: 256, 1>}, {pipeline_mode = #tpu.pipeline_mode<synchronous>, transform_indices = @transform_3, window_bounds = array<i64: 16, 32>}, {pipeline_mode = #tpu.pipeline_mode<synchronous>, transform_indices = @transform_4, window_bounds = array<i64: 1, 32>}, {pipeline_mode = #tpu.pipeline_mode<synchronous>, transform_indices = @transform_5, window_bounds = array<i64: 32, 32>}, {pipeline_mode = #tpu.pipeline_mode<synchronous>, transform_indices = @transform_6, window_bounds = array<i64: 1, 32>}, {pipeline_mode = #tpu.pipeline_mode<synchronous>, transform_indices = @transform_7, window_bounds = array<i64: 32, 8>}, {transform_indices = @transform_8, window_bounds = array<i64: 256, 8>}]} {
    %c0 = arith.constant 0 : index
    %c0_0 = arith.constant 0 : index
    %0 = vector.load %arg1[%c0, %c0_0] : memref<256x32xf32, #tpu.memory_space<vmem>>, vector<256x32xf32>
    %c0_1 = arith.constant 0 : index
    %c0_2 = arith.constant 0 : index
    %1 = vector.load %arg3[%c0_1, %c0_2] : memref<256x1xf32, #tpu.memory_space<vmem>>, vector<256x1xf32>
    %c0_3 = arith.constant 0 : index
    %c0_4 = arith.constant 0 : index
    %2 = vector.load %arg2[%c0_3, %c0_4] : memref<32x16xf32, #tpu.memory_space<vmem>>, vector<32x16xf32>
    %c0_5 = arith.constant 0 : index
    %c0_6 = arith.constant 0 : index
    %3 = vector.load %arg4[%c0_5, %c0_6] : memref<16x32xf32, #tpu.memory_space<vmem>>, vector<16x32xf32>
    %cst = arith.constant dense<0.000000e+00> : vector<32x32xf32>
    %4 = tpu.matmul %2, %3, %cst {dimension_numbers = #tpu.dot_dimension_numbers<[1], [0], [0], [1], [0, 0, 1, 1], [], []>} : vector<32x16xf32>, vector<16x32xf32>, vector<32x32xf32> -> vector<32x32xf32>
    %c0_7 = arith.constant 0 : index
    %c0_8 = arith.constant 0 : index
    %5 = vector.load %arg5[%c0_7, %c0_8] : memref<1x32xf32, #tpu.memory_space<vmem>>, vector<1x32xf32>
    %6 = vector.broadcast %5 : vector<1x32xf32> to vector<32x32xf32>
    %7 = arith.addf %4, %6 : vector<32x32xf32>
    %8 = vector.shape_cast %7 : vector<32x32xf32> to vector<32x1x32xf32>
    %9 = vector.shape_cast %8 : vector<32x1x32xf32> to vector<32x1x32xf32>
    %10 = vector.broadcast %9 : vector<32x1x32xf32> to vector<32x8x32xf32>
    %11 = vector.shape_cast %10 : vector<32x8x32xf32> to vector<256x32xf32>
    %12 = vector.broadcast %1 : vector<256x1xf32> to vector<256x32xf32>
    %13 = arith.mulf %0, %12 : vector<256x32xf32>
    %c0_9 = arith.constant 0 : index
    %c0_10 = arith.constant 0 : index
    %14 = vector.load %arg6[%c0_9, %c0_10] : memref<32x32xf32, #tpu.memory_space<vmem>>, vector<32x32xf32>
    %cst_11 = arith.constant dense<0.000000e+00> : vector<256x32xf32>
    %15 = tpu.matmul %13, %14, %cst_11 {dimension_numbers = #tpu.dot_dimension_numbers<[1], [0], [0], [1], [0, 0, 1, 1], [], []>} : vector<256x32xf32>, vector<32x32xf32>, vector<256x32xf32> -> vector<256x32xf32>
    %16 = vector.broadcast %1 : vector<256x1xf32> to vector<256x32xf32>
    %17 = arith.mulf %16, %11 : vector<256x32xf32>
    %18 = arith.addf %15, %17 : vector<256x32xf32>
    %c0_12 = arith.constant 0 : index
    %c0_13 = arith.constant 0 : index
    %19 = vector.load %arg7[%c0_12, %c0_13] : memref<1x32xf32, #tpu.memory_space<vmem>>, vector<1x32xf32>
    %20 = vector.broadcast %19 : vector<1x32xf32> to vector<256x32xf32>
    %21 = arith.addf %18, %20 : vector<256x32xf32>
    %cst_14 = arith.constant 0.000000e+00 : f32
    %22 = vector.broadcast %cst_14 : f32 to vector<256x32xf32>
    %23 = arith.maximumf %21, %22 : vector<256x32xf32>
    %c0_15 = arith.constant 0 : index
    %c0_16 = arith.constant 0 : index
    %24 = vector.load %arg8[%c0_15, %c0_16] : memref<32x8xf32, #tpu.memory_space<vmem>>, vector<32x8xf32>
    %cst_17 = arith.constant dense<0.000000e+00> : vector<256x8xf32>
    %25 = tpu.matmul %23, %24, %cst_17 {dimension_numbers = #tpu.dot_dimension_numbers<[1], [0], [0], [1], [0, 0, 1, 1], [], []>} : vector<256x32xf32>, vector<32x8xf32>, vector<256x8xf32> -> vector<256x8xf32>
    %cst_18 = arith.constant 1.000000e+00 : f32
    %26 = vector.broadcast %cst_18 : f32 to vector<256x8xf32>
    %27 = arith.addf %25, %26 : vector<256x8xf32>
    %c0_19 = arith.constant 0 : index
    %c0_20 = arith.constant 0 : index
    %28 = vector.load %arg9[%c0_19, %c0_20] : memref<256x8xf32, #tpu.memory_space<vmem>>, vector<256x8xf32>
    tpu.vector_store %arg9[%c0_19, %c0_20], %27 {strides = array<i32>} : memref<256x8xf32, #tpu.memory_space<vmem>>, vector<256x8xf32>,
    return
  }
  func.func @transform_0(%arg0: i32) -> (i32, i32) {
    %c0_i32 = arith.constant 0 : i32
    %c0_i32_0 = arith.constant 0 : i32
    return %arg0, %c0_i32 : i32, i32
  }
  func.func @transform_1(%arg0: i32) -> (i32, i32) {
    %c0_i32 = arith.constant 0 : i32
    %c0_i32_0 = arith.constant 0 : i32
    return %arg0, %c0_i32 : i32, i32
  }
  func.func @transform_2(%arg0: i32) -> (i32, i32) {
    %c0_i32 = arith.constant 0 : i32
    %c0_i32_0 = arith.constant 0 : i32
    return %arg0, %c0_i32 : i32, i32
  }
  func.func @transform_3(%arg0: i32) -> (i32, i32) {
    %c0_i32 = arith.constant 0 : i32
    %c0_i32_0 = arith.constant 0 : i32
    %c0_i32_1 = arith.constant 0 : i32
    return %c0_i32, %c0_i32_0 : i32, i32
  }
  func.func @transform_4(%arg0: i32) -> (i32, i32) {
    %c0_i32 = arith.constant 0 : i32
    %c0_i32_0 = arith.constant 0 : i32
    %c0_i32_1 = arith.constant 0 : i32
    return %c0_i32, %c0_i32_0 : i32, i32
  }
  func.func @transform_5(%arg0: i32) -> (i32, i32) {
    %c0_i32 = arith.constant 0 : i32
    %c0_i32_0 = arith.constant 0 : i32
    %c0_i32_1 = arith.constant 0 : i32
    return %c0_i32, %c0_i32_0 : i32, i32
  }
  func.func @transform_6(%arg0: i32) -> (i32, i32) {
    %c0_i32 = arith.constant 0 : i32
    %c0_i32_0 = arith.constant 0 : i32
    %c0_i32_1 = arith.constant 0 : i32
    return %c0_i32, %c0_i32_0 : i32, i32
  }
  func.func @transform_7(%arg0: i32) -> (i32, i32) {
    %c0_i32 = arith.constant 0 : i32
    %c0_i32_0 = arith.constant 0 : i32
    %c0_i32_1 = arith.constant 0 : i32
    return %c0_i32, %c0_i32_0 : i32, i32
  }
  func.func @transform_8(%arg0: i32) -> (i32, i32) {
    %c0_i32 = arith.constant 0 : i32
    %c0_i32_0 = arith.constant 0 : i32
    return %arg0, %c0_i32 : i32, i32
  }
}

</mosaic_0001>

<bundles_post_ra>
// kernel: tpu_custom_call.1
= control target key start
LH: loop header
LB: loop body
LE: loop exit
PB: predicated region body
PF: predicated region fallthrough
CT: control target
= control target key end

     0   :  { %s2319_s27 = smov 0   ;;  %s2826_s0 = inlined_call_operand.vmem [shape: f32[512,32], index: 0, kind: input, shape index: {}]   ;;  %s2827_s1 = inlined_call_operand.vmem [shape: f32[64,16], index: 1, kind: input, shape index: {}]   ;;  %s2828_s2 = inlined_call_operand.vmem [shape: f32[512,1], index: 2, kind: input, shape index: {}]   ;;  %s2829_s3 = inlined_call_operand.vmem [shape: f32[16,32], index: 3, kind: input, shape index: {}]   ;;  %s2830_s4 = inlined_call_operand.vmem [shape: f32[1,32], index: 4, kind: input, shape index: {}]   ;;  %s2831_s5 = inlined_call_operand.vmem [shape: f32[32,32], index: 5, kind: input, shape index: {}]   ;;  %s2832_s6 = inlined_call_operand.vmem [shape: f32[1,32], index: 6, kind: input, shape index: {}]   ;;  %s2833_s7 = inlined_call_operand.vmem [shape: f32[32,8], index: 7, kind: input, shape index: {}]   ;;  %s2834_s8 = inlined_call_operand.vmem [shape: f32[512,8], index: 8, kind: output, shape index: {}]  }
   0x1 LB: > { %s1947_s28 = sadd.s32 4294967295, %s2270_s27   ;;  %p1951_p0 = scmp.ge.s32.totalorder %s2270_s27, 1  ;;  %s2270_s27 = sphi %s2319_s27, %s18_s27  }
   0x2   : > { %p285_p1 = scmp.lt.s32.totalorder %s2270_s27, 3 }
   0x4   : > { %p286_p2 = pnand %p1951_p0, %p285_p1 }
   0x5   : > { %v421_v0 = vld [vmem:[%s2829_s3] sm:$0xff] (!%p286_p2)  ;;  %v422_v1 = vld [vmem:[%s2829_s3 + $0x8] sm:$0xff] (!%p286_p2)  ;;  %s1954_s11 = sshll.u32 (!%p286_p2), %s1947_s28, 2  ;;  %s1952_s12 = sshll.u32 (!%p286_p2), %s1947_s28, 5  ;;  %v2272_v3 = vmov (!%p286_p2), 0   ;;  %vm430_vm0 = vcmask (!%p286_p2), 130048  }
   0x6   : > { %289 = sbr.rel (%p286_p2) target bundleno = 648 (0x288), region = 52  ;;  %v2232_v2 = vpack.c.bf16 (!%p286_p2), %v422_v1, %v421_v0  ;;  %2263 = vset.pattern.permute.xlu1 (!%p286_p2), %v2272_v3  ;;  %2262 = vset.pattern.permute.xlu0 (!%p286_p2), %v2272_v3  ;;  %p336_p3 = scmp.lt.s32.totalorder (!%p286_p2), %s1954_s11, 7  ;;  %v1080_v4 = vld [vmem:[%s2831_s5] sm:$0xff] (!%p286_p2)  ;;  %v1081_v5 = vld [vmem:[%s2831_s5 + $0x8] sm:$0xff] (!%p286_p2)  ;;  %v1082_v19 = vld [vmem:[%s2831_s5 + $0x10] sm:$0xff] (!%p286_p2)  ;;  %vm1116_vm1 = vcmask (!%p286_p2), 261120  }
   0x7   : > { %p330_p4 = scmp.lt.s32.totalorder (!%p286_p2), %s1952_s12, 63  ;;  %v2236_v6 = vpack.c.bf16 (!%p286_p2), %v1081_v5, %v1080_v4  ;;  %v1083_v20 = vld [vmem:[%s2831_s5 + $0x18] sm:$0xff] (!%p286_p2)  ;;  %vm1834_vm2 = vcmask (!%p286_p2), 64512  }
   0x8   : > { %2233 = vmatprep.subr.bf16.mxu0 (!%p286_p2), %v2232_v2  ;;  %v2240_v21 = vpack.c.bf16 (!%p286_p2), %v1083_v20, %v1082_v19 }
   0x9   : > { %2235 = vmatpush3.bf16.msra.mxu0 (!%p286_p2), %v2232_v2  ;;  %2237 = vmatprep.subr.bf16.mxu1 (!%p286_p2), %v2236_v6 }
   0xa   : > { %2239 = vmatpush3.bf16.msra.mxu1 (!%p286_p2), %v2236_v6 }
   0xb   : > { %2241 = vmatprep.subr.bf16.mxu1 (!%p286_p2), %v2240_v21 }
   0xd   : > { %s2836_s11 = smov (!%p336_p3, %s1954_s11), 7  ;;  %s2838_s12 = smov (!%p330_p4, %s1952_s12), 63 }
   0xe   : > { %s1955_s17 = sshll.u32 %s2836_s11, 3  ;;  %s2342_s21 = sshll.u32 %s2838_s12, 3  ;;  %2243 = vmatpush3.bf16.msra.mxu1 %v2240_v21 }
   0xf   : > { %s339_s20 = scalar_lea.vmem %s2827_s1, %s1955_s17  ;;  %s2348_s24 = scalar_lea.vmem %s2828_s2, %s2342_s21 }
  0x10   : > { %v417_v7 = vld [vmem:[%s339_s20] sm:$0xff]  ;;  %v418_v8 = vld [vmem:[%s339_s20 + $0x8] sm:$0xff]  ;;  %v387_v9 = vld [vmem:[%s2348_s24 + $0x10] sm:$0xff]  ;;  %s2396_s10 = scalar_lea.vmem %s2826_s0, %s2342_s21  ;;  %s2757_s26 = scalar_lea.vmem %s2834_s8, %s2342_s21 }
  0x11   : > { %2114 = vmatprep.mubr.msk.f32.mxu0 %vm430_vm0, %v417_v7  ;;  %v385_v10 = vld [vmem:[%s2348_s24] sm:$0xff]  ;;  %v419_v11 = vld [vmem:[%s339_s20 + $0x10] sm:$0xff]  ;;  %900 = vperm.xlu1 %2263, %v387_v9   ;;  %v388_v12 = vld [vmem:[%s2348_s24 + $0x18] sm:$0xff] }
  0x12   : > { %890 = vperm.xlu0 %2262, %v385_v10   ;;  %2115 = vmatmul.mubr.msk.f32.vlgmr.msra.gmra.mrb[0].mxu0 %vm430_vm0, %v418_v8  ;;  %v386_v13 = vld [vmem:[%s2348_s24 + $0x8] sm:$0xff]  ;;  %v420_v14 = vld [vmem:[%s339_s20 + $0x18] sm:$0xff]  ;;  %v389_v16 = vld [vmem:[%s2348_s24 + $0x20] sm:$0xff] }
  0x13   : > { %2117 = vmatprep.mubr.msk.f32.mxu0 %vm430_vm0, %v419_v11  ;;  %v390_v15 = vld [vmem:[%s2348_s24 + $0x28] sm:$0xff]  ;;  %v392_v17 = vld [vmem:[%s2348_s24 + $0x38] sm:$0xff]  ;;  %v391_v18 = vld [vmem:[%s2348_s24 + $0x30] sm:$0xff] }
  0x14   : > { %v394_v22 = vld [vmem:[%s2348_s24 + $0x48] sm:$0xff]  ;;  %v393_v23 = vld [vmem:[%s2348_s24 + $0x40] sm:$0xff]  ;;  %v396_v24 = vld [vmem:[%s2348_s24 + $0x58] sm:$0xff] }
  0x15   : > { %905 = vperm.xlu1 %2263, %v388_v12   ;;  %v395_v25 = vld [vmem:[%s2348_s24 + $0x50] sm:$0xff]  ;;  %v398_v26 = vld [vmem:[%s2348_s24 + $0x68] sm:$0xff]  ;;  %v397_v27 = vld [vmem:[%s2348_s24 + $0x60] sm:$0xff] }
  0x16   : > { %895 = vperm.xlu0 %2262, %v386_v13   ;;  %2118 = vmatmul.mubr.msk.f32.gmra.mrb[2].mxu0 %vm430_vm0, %v420_v14  ;;  %v400_v28 = vld [vmem:[%s2348_s24 + $0x78] sm:$0xff]  ;;  %v399_v29 = vld [vmem:[%s2348_s24 + $0x70] sm:$0xff]  ;;  %v402_v30 = vld [vmem:[%s2348_s24 + $0x88] sm:$0xff] }
  0x17   : > { %v401_v31 = vld [vmem:[%s2348_s24 + $0x80] sm:$0xff]  ;;  %v404_v32 = vld [vmem:[%s2348_s24 + $0x98] sm:$0xff]  ;;  %v403_v33 = vld [vmem:[%s2348_s24 + $0x90] sm:$0xff] }
  0x18   : > { %v406_v34 = vld [vmem:[%s2348_s24 + $0xa8] sm:$0xff]  ;;  %v405_v35 = vld [vmem:[%s2348_s24 + $0xa0] sm:$0xff]  ;;  %v408_v36 = vld [vmem:[%s2348_s24 + $0xb8] sm:$0xff] }
  0x19   : > { %915 = vperm.xlu1 %2263, %v390_v15   ;;  %v407_v37 = vld [vmem:[%s2348_s24 + $0xb0] sm:$0xff]  ;;  %v410_v38 = vld [vmem:[%s2348_s24 + $0xc8] sm:$0xff]  ;;  %v409_v39 = vld [vmem:[%s2348_s24 + $0xc0] sm:$0xff] }
  0x1a   : > { %910 = vperm.xlu0 %2262, %v389_v16   ;;  %v412_v40 = vld [vmem:[%s2348_s24 + $0xd8] sm:$0xff]  ;;  %v411_v41 = vld [vmem:[%s2348_s24 + $0xd0] sm:$0xff]  ;;  %v414_v42 = vld [vmem:[%s2348_s24 + $0xe8] sm:$0xff] }
  0x1b   : > { %v413_v43 = vld [vmem:[%s2348_s24 + $0xe0] sm:$0xff]  ;;  %v416_v44 = vld [vmem:[%s2348_s24 + $0xf8] sm:$0xff]  ;;  %v415_v45 = vld [vmem:[%s2348_s24 + $0xf0] sm:$0xff] }
  0x1c   : > { %v353_v46 = vld [vmem:[%s2396_s10] sm:$0xff]  ;;  %v355_v49 = vld [vmem:[%s2396_s10 + $0x10] sm:$0xff]  ;;  %v354_v51 = vld [vmem:[%s2396_s10 + $0x8] sm:$0xff] }
  0x1d   : > { %925 = vperm.xlu1 %2263, %v392_v17   ;;  %v356_v56 = vld [vmem:[%s2396_s10 + $0x18] sm:$0xff]  ;;  %v357_v57 = vld [vmem:[%s2396_s10 + $0x20] sm:$0xff]  ;;  %v358_v62 = vld [vmem:[%s2396_s10 + $0x28] sm:$0xff] }
  0x1e   : > { %920 = vperm.xlu0 %2262, %v391_v18   ;;  %v359_v63 = vld [vmem:[%s2396_s10 + $0x30] sm:$0xff]  ;;  %v360_v4 = vld [vmem:[%s2396_s10 + $0x38] sm:$0xff]  ;;  %v361_v5 = vld [vmem:[%s2396_s10 + $0x40] sm:$0xff] }
  0x1f   : > { %v362_v10 = vld [vmem:[%s2396_s10 + $0x48] sm:$0xff]  ;;  %v363_v11 = vld [vmem:[%s2396_s10 + $0x50] sm:$0xff]  ;;  %v364_v16 = vld [vmem:[%s2396_s10 + $0x58] sm:$0xff] }
  0x20   : > { %v365_v17 = vld [vmem:[%s2396_s10 + $0x60] sm:$0xff] }
  0x21   : > { %935 = vperm.xlu1 %2263, %v394_v22   ;;  %v366_v22 = vld [vmem:[%s2396_s10 + $0x68] sm:$0xff] }
  0x22   : > { %930 = vperm.xlu0 %2262, %v393_v23   ;;  %v367_v23 = vld [vmem:[%s2396_s10 + $0x70] sm:$0xff] }
  0x25   : > { %945 = vperm.xlu1 %2263, %v396_v24  }
  0x26   : > { %940 = vperm.xlu0 %2262, %v395_v25  }
  0x29   : > { %955 = vperm.xlu1 %2263, %v398_v26  }
  0x2a   : > { %950 = vperm.xlu0 %2262, %v397_v27  }
  0x2d   : > { %965 = vperm.xlu1 %2263, %v400_v28   ;;  %v368_v28 = vld [vmem:[%s2396_s10 + $0x78] sm:$0xff] }
  0x2e   : > { %960 = vperm.xlu0 %2262, %v399_v29   ;;  %v369_v29 = vld [vmem:[%s2396_s10 + $0x80] sm:$0xff] }
  0x31   : > { %975 = vperm.xlu1 %2263, %v402_v30  }
  0x32   : > { %970 = vperm.xlu0 %2262, %v401_v31  }
  0x35   : > { %985 = vperm.xlu1 %2263, %v404_v32  }
  0x36   : > { %980 = vperm.xlu0 %2262, %v403_v33  }
  0x39   : > { %995 = vperm.xlu1 %2263, %v406_v34   ;;  %v370_v34 = vld [vmem:[%s2396_s10 + $0x88] sm:$0xff] }
  0x3a   : > { %990 = vperm.xlu0 %2262, %v405_v35   ;;  %v371_v35 = vld [vmem:[%s2396_s10 + $0x90] sm:$0xff] }
  0x3d   : > { %1005 = vperm.xlu1 %2263, %v408_v36  }
  0x3e   : > { %1000 = vperm.xlu0 %2262, %v407_v37  }
  0x41   : > { %1015 = vperm.xlu1 %2263, %v410_v38  }
  0x42   : > { %1010 = vperm.xlu0 %2262, %v409_v39  }
  0x45   : > { %1025 = vperm.xlu1 %2263, %v412_v40   ;;  %v372_v40 = vld [vmem:[%s2396_s10 + $0x98] sm:$0xff] }
  0x46   : > { %1020 = vperm.xlu0 %2262, %v411_v41   ;;  %v373_v41 = vld [vmem:[%s2396_s10 + $0xa0] sm:$0xff] }
  0x49   : > { %1035 = vperm.xlu1 %2263, %v414_v42  }
  0x4a   : > { %1030 = vperm.xlu0 %2262, %v413_v43  }
  0x4d   : > { %1045 = vperm.xlu1 %2263, %v416_v44  }
  0x4e   : > { %1040 = vperm.xlu0 %2262, %v415_v45  }
  0x90   : > { %v2399_v47 = vpop.permute.xlu1 %900 }
  0x91   : > { %v2401_v48 = vpop.permute.xlu0 %890  ;;  %v1050_v52 = vmul.f32 %v2399_v47, %v355_v49  ;;  %v375_v49 = vld [vmem:[%s2396_s10 + $0xb0] sm:$0xff] }
  0x92   : > { %v1048_v50 = vmul.f32 %v2401_v48, %v353_v46  ;;  %v374_v46 = vld [vmem:[%s2396_s10 + $0xa8] sm:$0xff] }
  0x94   : > { %2128 = vmatprep.mubr.msk.f32.mxu1 %vm1116_vm1, %v1048_v50  ;;  %v2408_v53 = vpop.permute.xlu1 %905 }
  0x95   : > { %v2410_v54 = vpop.permute.xlu0 %895  ;;  %v1051_v60 = vmul.f32 %v2408_v53, %v356_v56  ;;  %v376_v56 = vld [vmem:[%s2396_s10 + $0xb8] sm:$0xff] }
  0x96   : > { %v1049_v55 = vmul.f32 %v2410_v54, %v354_v51 }
  0x98   : > { %2129 = vmatmul.mubr.msk.f32.vlgmr.msra.gmra.mrb[0].mxu1 %vm1116_vm1, %v1049_v55  ;;  %v2416_v58 = vpop.permute.xlu1 %915 }
  0x99   : > { %v2418_v59 = vpop.permute.xlu0 %910  ;;  %2131 = vmatprep.mubr.msk.f32.mxu1 %vm1116_vm1, %v1050_v52  ;;  %v1053_v2 = vmul.f32 %v2416_v58, %v358_v62 }
  0x9a   : > { %v1052_v61 = vmul.f32 %v2418_v59, %v357_v57  ;;  %v377_v57 = vld [vmem:[%s2396_s10 + $0xc0] sm:$0xff] }
  0x9c   : > { %2132 = vmatmul.mubr.msk.f32.gmra.mrb[2].mxu1 %vm1116_vm1, %v1051_v60  ;;  %v2426_v0 = vpop.permute.xlu1 %925 }
  0x9d   : > { %v2428_v1 = vpop.permute.xlu0 %920  ;;  %2134 = vmatprep.mubr.msk.f32.mxu1 %vm1116_vm1, %v1052_v61  ;;  %v1055_v8 = vmul.f32 %v2426_v0, %v360_v4 }
  0x9e   : > { %v1054_v3 = vmul.f32 %v2428_v1, %v359_v63 }
  0xa0   : > { %2135 = vmatmul.mubr.msk.f32.gmra.mrb[4].mxu1 %vm1116_vm1, %v1053_v2  ;;  %v2436_v6 = vpop.permute.xlu1 %935  ;;  %v378_v2 = vld [vmem:[%s2396_s10 + $0xc8] sm:$0xff] }
  0xa1   : > { %v2438_v7 = vpop.permute.xlu0 %930  ;;  %2137 = vmatprep.mubr.msk.f32.mxu1 %vm1116_vm1, %v1054_v3  ;;  %v1057_v14 = vmul.f32 %v2436_v6, %v362_v10  ;;  %v379_v3 = vld [vmem:[%s2396_s10 + $0xd0] sm:$0xff]  ;;  %v380_v10 = vld [vmem:[%s2396_s10 + $0xd8] sm:$0xff] }
  0xa2   : > { %v1056_v9 = vmul.f32 %v2438_v7, %v361_v5 }
  0xa4   : > { %2138 = vmatmul.mubr.msk.f32.gmra.mrb[6].mxu1 %vm1116_vm1, %v1055_v8  ;;  %v2446_v12 = vpop.permute.xlu1 %945 }
  0xa5   : > { %v2448_v13 = vpop.permute.xlu0 %940  ;;  %2140 = vmatprep.mubr.msk.f32.mxu1 %vm1116_vm1, %v1056_v9  ;;  %v1059_v20 = vmul.f32 %v2446_v12, %v364_v16 }
  0xa6   : > { %v1058_v15 = vmul.f32 %v2448_v13, %v363_v11  ;;  %v381_v11 = vld [vmem:[%s2396_s10 + $0xe0] sm:$0xff] }
  0xa8   : > { %2141 = vmatmul.mubr.msk.f32.gmra.mrb[8].mxu1 %vm1116_vm1, %v1057_v14  ;;  %v2456_v18 = vpop.permute.xlu1 %955 }
  0xa9   : > { %v2458_v19 = vpop.permute.xlu0 %950  ;;  %2143 = vmatprep.mubr.msk.f32.mxu1 %vm1116_vm1, %v1058_v15  ;;  %v1061_v26 = vmul.f32 %v2456_v18, %v366_v22 }
  0xaa   : > { %v1060_v21 = vmul.f32 %v2458_v19, %v365_v17 }
  0xac   : > { %2144 = vmatmul.mubr.msk.f32.gmra.mrb[10].mxu1 %vm1116_vm1, %v1059_v20  ;;  %v2466_v24 = vpop.permute.xlu1 %965  ;;  %v382_v20 = vld [vmem:[%s2396_s10 + $0xe8] sm:$0xff] }
  0xad   : > { %v2468_v25 = vpop.permute.xlu0 %960  ;;  %2146 = vmatprep.mubr.msk.f32.mxu1 %vm1116_vm1, %v1060_v21  ;;  %v1063_v32 = vmul.f32 %v2466_v24, %v368_v28  ;;  %v383_v21 = vld [vmem:[%s2396_s10 + $0xf0] sm:$0xff]  ;;  %v384_v28 = vld [vmem:[%s2396_s10 + $0xf8] sm:$0xff] }
  0xae   : > { %v1062_v27 = vmul.f32 %v2468_v25, %v367_v23 }
  0xb0   : > { %2147 = vmatmul.mubr.msk.f32.gmra.mrb[12].mxu1 %vm1116_vm1, %v1061_v26  ;;  %v2476_v30 = vpop.permute.xlu1 %975 }
  0xb1   : > { %v2478_v31 = vpop.permute.xlu0 %970  ;;  %2149 = vmatprep.mubr.msk.f32.mxu1 %vm1116_vm1, %v1062_v27  ;;  %v1065_v38 = vmul.f32 %v2476_v30, %v370_v34  ;;  %v1509_v34 = vld [vmem:[%s2833_s7] sm:$0xff] }
  0xb2   : > { %v1064_v33 = vmul.f32 %v2478_v31, %v369_v29 }
  0xb4   : > { %2150 = vmatmul.mubr.msk.f32.gmra.mrb[14].mxu1 %vm1116_vm1, %v1063_v32  ;;  %v2486_v36 = vpop.permute.xlu1 %985 }
  0xb5   : > { %v2488_v37 = vpop.permute.xlu0 %980  ;;  %2152 = vmatprep.mubr.msk.f32.mxu1 %vm1116_vm1, %v1064_v33  ;;  %v1067_v44 = vmul.f32 %v2486_v36, %v372_v40 }
  0xb6   : > { %v1066_v39 = vmul.f32 %v2488_v37, %v371_v35  ;;  %v1510_v35 = vld [vmem:[%s2833_s7 + $0x8] sm:$0xff] }
  0xb8   : > { %2153 = vmatmul.mubr.msk.f32.gmra.mrb[16].mxu1 %vm1116_vm1, %v1065_v38  ;;  %v2496_v42 = vpop.permute.xlu1 %995 }
  0xb9   : > { %v2498_v43 = vpop.permute.xlu0 %990  ;;  %2155 = vmatprep.mubr.msk.f32.mxu1 %vm1116_vm1, %v1066_v39  ;;  %v1069_v52 = vmul.f32 %v2496_v42, %v374_v46  ;;  %v2244_v39 = vpack.c.bf16 %v1510_v35, %v1509_v34  ;;  %v1511_v46 = vld [vmem:[%s2833_s7 + $0x10] sm:$0xff] }
  0xba   : > { %v1068_v45 = vmul.f32 %v2498_v43, %v373_v41  ;;  %v2273_v41 = vmov 1966171168  }
  0xbb   : > { %2245 = vmatprep.subr.bf16.mxu0 %v2244_v39 }
  0xbc   : > { %2156 = vmatmul.mubr.msk.f32.gmra.mrb[18].mxu1 %vm1116_vm1, %v1067_v44  ;;  %v2506_v50 = vpop.permute.xlu1 %1005  ;;  %v534_v44 = vunpack.c.l.s4 %v2273_v41  ;;  %2247 = vmatpush3.bf16.msra.mxu0 %v2244_v39 }
  0xbd   : > { %v2508_v51 = vpop.permute.xlu0 %1000  ;;  %2158 = vmatprep.mubr.msk.f32.mxu1 %vm1116_vm1, %v1068_v45  ;;  %v1071_v62 = vmul.f32 %v2506_v50, %v376_v56  ;;  %v536_v45 = vlaneseq  ;;  %v2563_v56 = vld [vmem:[%s2830_s4] ss:$0 sm:$0xff] }
  0xbe   : > { %v1070_v55 = vmul.f32 %v2508_v51, %v375_v49  ;;  %v1512_v49 = vld [vmem:[%s2833_s7 + $0x18] sm:$0xff] }
  0xc0   : > { %2159 = vmatmul.mubr.msk.f32.gmra.mrb[20].mxu1 %vm1116_vm1, %v1069_v52  ;;  %v2516_v60 = vpop.permute.xlu1 %1015  ;;  %v535_v52 = vunpack.c.0.s8 %v534_v44 }
  0xc1   : > { %v2518_v61 = vpop.permute.xlu0 %1010  ;;  %2161 = vmatprep.mubr.msk.f32.mxu1 %vm1116_vm1, %v1070_v55  ;;  %v1073_v8 = vmul.f32 %v2516_v60, %v378_v2  ;;  %v537_v55 = vshrl.u32 %v536_v45, 7 }
  0xc2   : > { %v1072_v63 = vmul.f32 %v2518_v61, %v377_v57  ;;  %v2248_v57 = vpack.c.bf16 %v1512_v49, %v1511_v46 }
  0xc4   : > { %2162 = vmatmul.mubr.msk.f32.gmra.mrb[22].mxu1 %vm1116_vm1, %v1071_v62  ;;  %v2526_v4 = vpop.permute.xlu1 %1025  ;;  %2249 = vmatprep.subr.bf16.mxu0 %v2248_v57 }
  0xc5   : > { %v2528_v5 = vpop.permute.xlu0 %1020  ;;  %2164 = vmatprep.mubr.msk.f32.mxu1 %vm1116_vm1, %v1072_v63  ;;  %v1075_v16 = vmul.f32 %v2526_v4, %v380_v10  ;;  %v2566_v63 = vsub.s32 %v535_v52, %v537_v55  ;;  %2251 = vmatpush3.bf16.msra.mxu0 %v2248_v57 }
  0xc6   : > { %v1074_v9 = vmul.f32 %v2528_v5, %v379_v3 }
  0xc8   : > { %2165 = vmatmul.mubr.msk.f32.gmra.mrb[24].mxu1 %vm1116_vm1, %v1073_v8  ;;  %v1036_v14 = vpop.permute.xlu1 %1035 }
  0xc9   : > { %v1031_v15 = vpop.permute.xlu0 %1030  ;;  %2167 = vmatprep.mubr.msk.f32.mxu1 %vm1116_vm1, %v1074_v9  ;;  %v1077_v23 = vmul.f32 %v1036_v14, %v382_v20 }
  0xca   : > { %v1076_v17 = vmul.f32 %v1031_v15, %v381_v11  ;;  %v2573_v11 = vsub.s32 0, %v537_v55 }
  0xcc   : > { %2168 = vmatmul.mubr.msk.f32.gmra.mrb[26].mxu1 %vm1116_vm1, %v1075_v16  ;;  %v1046_v27 = vpop.permute.xlu1 %1045 }
  0xcd   : > { %v1041_v22 = vpop.permute.xlu0 %1040  ;;  %2170 = vmatprep.mubr.msk.f32.mxu1 %vm1116_vm1, %v1076_v17  ;;  %v1079_v29 = vmul.f32 %v1046_v27, %v384_v28 }
  0xce   : > { %v1078_v26 = vmul.f32 %v1041_v22, %v383_v21 }
  0xd0   : > { %2171 = vmatmul.mubr.msk.f32.gmra.mrb[28].mxu1 %vm1116_vm1, %v1077_v23 }
  0xd1   : > { %2173 = vmatprep.mubr.msk.f32.mxu1 %vm1116_vm1, %v1078_v26 }
  0xd4   : > { %2174 = vmatmul.mubr.msk.f32.gmra.mrb[30].mxu1 %vm1116_vm1, %v1079_v29 }
  0xe5   : > { %v2116_v32 = vpop.f32.mrb[0].mxu0 }
  0xe6   : > { %v509_v33 = vpop.f32.mrb[1].mxu0 }
  0xe9   : > { %v2119_v38 = vpop.f32.mrb[2].mxu0 }
  0xea   : > { %v2552_v40 = vpop.f32.mrb[3].mxu0  ;;  %v525_v62 = vadd.f32 %v2119_v38, %v2563_v56 }
  0xec   : > { %v686_v2 = vrot.slane %v525_v62, %v2566_v63  ;;  %v679_v3 = vcombine.high %v525_v62, %v525_v62 }
  0xee   : > { %v694_v8 = vcombine.high %v686_v2, %v686_v2  ;;  %v693_v9 = vrot.slane %v679_v3, %v2566_v63  ;;  %v2571_v10 = vrot.slane %v686_v2, %v2566_v63 }
  0xf0   : > { %v716_v16 = vrot.slane %v694_v8, %v2566_v63  ;;  %v695_v17 = vcombine.high %v693_v9, %v693_v9  ;;  %v827_v21 = vrot.slane %v2571_v10, %v2573_v11  ;;  %v709_v35 = vrot.slane %v693_v9, %v2566_v63 }
  0xf2   : > { %v831_v20 = vrot.slane %v716_v16, %v2573_v11  ;;  %v726_v23 = vcombine.high %v716_v16, %v716_v16  ;;  %v2583_v28 = vmul.f32 %v2518_v61, %v827_v21  ;;  %v723_v34 = vrot.slane %v695_v17, %v2566_v63 }
  0xf3   : > { %v843_v44 = vrot.slane %v709_v35, %v2573_v11  ;;  %v725_v45 = vcombine.high %v709_v35, %v709_v35 }
  0xf4   : > { %v2580_v26 = vmul.f32 %v2516_v60, %v831_v20  ;;  %v839_v29 = vrot.slane %v726_v23, %v2573_v11  ;;  %v847_v39 = vrot.slane %v723_v34, %v2573_v11  ;;  %v727_v41 = vcombine.high %v723_v34, %v723_v34 }
  0xf5   : > { %v2596_v46 = vmul.f32 %v1031_v15, %v843_v44  ;;  %v851_v49 = vrot.slane %v725_v45, %v2573_v11  ;;  %v515_v15 = vadd.f32 %v2116_v32, %v2563_v56  ;;  %v2618_v32 = vld [vmem:[%s2832_s6] ss:$0 sm:$0xff] }
  0xf6   : > { %v2589_v38 = vmul.f32 %v2526_v4, %v839_v29  ;;  %v2593_v60 = vmul.f32 %v1036_v14, %v847_v39  ;;  %v855_v61 = vrot.slane %v727_v41, %v2573_v11  ;;  %v510_v4 = vadd.f32 %v2563_v56, %v509_v33 }
  0xf7   : > { %v2601_v55 = vmul.f32 %v1041_v22, %v851_v49  ;;  %v588_v33 = vrot.slane %v515_v15, %v2566_v63  ;;  %v581_v45 = vcombine.high %v515_v15, %v515_v15 }
  0xf8   : > { %v2599_v52 = vmul.f32 %v1046_v27, %v855_v61  ;;  %v539_v57 = vrot.slane %v510_v4, %v2566_v63  ;;  %v532_v62 = vcombine.high %v510_v4, %v510_v4 }
  0xf9   : > { %v595_v15 = vrot.slane %v581_v45, %v2566_v63 }
  0xfa   : > { %v547_v2 = vcombine.high %v539_v57, %v539_v57  ;;  %v546_v3 = vrot.slane %v532_v62, %v2566_v63  ;;  %v555_v8 = vrot.slane %v539_v57, %v2566_v63 }
  0xfc   : > { %v569_v14 = vrot.slane %v547_v2, %v2566_v63  ;;  %v548_v9 = vcombine.high %v546_v3, %v546_v3  ;;  %v731_v22 = vrot.slane %v555_v8, %v2573_v11  ;;  %v577_v17 = vcombine.high %v555_v8, %v555_v8 }
  0xfd   : > { %v562_v39 = vrot.slane %v546_v3, %v2566_v63 }
  0xfe   : > { %v735_v27 = vrot.slane %v569_v14, %v2573_v11  ;;  %v579_v16 = vcombine.high %v569_v14, %v569_v14  ;;  %v576_v23 = vrot.slane %v548_v9, %v2566_v63  ;;  %v1084_v34 = vmul.f32 %v2401_v48, %v731_v22 }
  0xff   : > { %v739_v35 = vrot.slane %v577_v17, %v2573_v11  ;;  %v747_v8 = vrot.slane %v562_v39, %v2573_v11  ;;  %v578_v3 = vcombine.high %v562_v39, %v562_v39 }
 0x100   : > { %v1085_v20 = vmul.f32 %v2410_v54, %v735_v27  ;;  %v743_v21 = vrot.slane %v579_v16, %v2573_v11  ;;  %v596_v54 = vcombine.high %v588_v33, %v588_v33  ;;  %v751_v57 = vrot.slane %v576_v23, %v2573_v11 }
 0x101   : > { %v580_v62 = vcombine.high %v576_v23, %v576_v23  ;;  %v1086_v48 = vmul.f32 %v2399_v47, %v739_v35  ;;  %v604_v47 = vrot.slane %v588_v33, %v2566_v63  ;;  %v1088_v35 = vmul.f32 %v2418_v59, %v747_v8 }
 0x102   : > { %v1087_v4 = vmul.f32 %v2408_v53, %v743_v21  ;;  %v618_v17 = vrot.slane %v596_v54, %v2566_v63  ;;  %v1089_v21 = vmul.f32 %v2416_v58, %v751_v57  ;;  %v755_v39 = vrot.slane %v578_v3, %v2573_v11 }
 0x103   : > { %v759_v23 = vrot.slane %v580_v62, %v2573_v11  ;;  %v597_v58 = vcombine.high %v595_v15, %v595_v15 }
 0x104   : > { %v628_v33 = vcombine.high %v618_v17, %v618_v17  ;;  %v767_v59 = vrot.slane %v618_v17, %v2573_v11 }
 0x105   : > { %v1091_v57 = vmul.f32 %v2426_v0, %v759_v23 }
 0x106   : > { %v1093_v17 = vmul.f32 %v2436_v6, %v767_v59 }
 0x16b   : > { %v2130_v29 = vpop.f32.mrb[0].mxu1 }
 0x16c   : > { %v1285_v41 = vadd.f32 %v2130_v29, %v1085_v20  ;;  %v1279_v44 = vpop.f32.mrb[1].mxu1 }
 0x16d   : > { %v1280_v61 = vadd.f32 %v1279_v44, %v1084_v34 }
 0x16e   : > { %v1446_v49 = vadd.f32 %v2618_v32, %v1285_v41  ;;  %v520_v41 = vadd.f32 %v2563_v56, %v2552_v40  ;;  %v1090_v40 = vmul.f32 %v2428_v1, %v755_v39  ;;  %v763_v56 = vrot.slane %v604_v47, %v2573_v11 }
 0x16f   : > { %v1445_v2 = vadd.f32 %v2618_v32, %v1280_v61  ;;  %v2133_v14 = vpop.f32.mrb[2].mxu1  ;;  %v625_v1 = vrot.slane %v597_v58, %v2566_v63 }
 0x170   : > { %v1295_v9 = vadd.f32 %v2133_v14, %v1087_v4  ;;  %v1289_v27 = vpop.f32.mrb[3].mxu1  ;;  %v1478_v53 = vmax.f32 %v1446_v49, 0.0  ;;  %v626_v14 = vcombine.high %v604_v47, %v604_v47  ;;  %v637_v3 = vrot.slane %v520_v41, %v2566_v63 }
 0x171   : > { %v1477_v16 = vmax.f32 %v1445_v2, 0.0  ;;  %v1290_v22 = vadd.f32 %v1289_v27, %v1086_v48  ;;  %v775_v27 = vrot.slane %v628_v33, %v2573_v11  ;;  %v611_v47 = vrot.slane %v595_v15, %v2566_v63 }
 0x172   : > { %v1448_v20 = vadd.f32 %v2618_v32, %v1295_v9  ;;  %v771_v23 = vrot.slane %v626_v14, %v2573_v11  ;;  %v645_v39 = vcombine.high %v637_v3, %v637_v3 }
 0x173   : > { %v1447_v29 = vadd.f32 %v2618_v32, %v1290_v22  ;;  %v2136_v34 = vpop.f32.mrb[4].mxu1  ;;  %2184 = vmatprep.mubr.msk.f32.mxu0 %vm1116_vm1, %v1477_v16 }
 0x174   : > { %v1305_v44 = vadd.f32 %v2136_v34, %v1089_v21  ;;  %v1299_v45 = vpop.f32.mrb[5].mxu1  ;;  %2185 = vmatmul.mubr.msk.f32.vlgmr.msra.gmra.mrb[4].mxu0 %vm1116_vm1, %v1478_v53  ;;  %v1480_v49 = vmax.f32 %v1448_v20, 0.0  ;;  %v1092_v21 = vmul.f32 %v2438_v7, %v763_v56  ;;  %v629_v7 = vcombine.high %v625_v1, %v625_v1 }
 0x175   : > { %v1479_v54 = vmax.f32 %v1447_v29, 0.0  ;;  %v1300_v61 = vadd.f32 %v1299_v45, %v1088_v35  ;;  %v630_v29 = vcombine.high %v520_v41, %v520_v41  ;;  %v1095_v45 = vmul.f32 %v2446_v12, %v775_v27 }
 0x176   : > { %v1450_v4 = vadd.f32 %v2618_v32, %v1305_v44  ;;  %v1094_v15 = vmul.f32 %v2448_v13, %v771_v23  ;;  %v779_v41 = vrot.slane %v611_v47, %v2573_v11  ;;  %v791_v13 = vrot.slane %v629_v7, %v2573_v11 }
 0x177   : > { %v1449_v62 = vadd.f32 %v2618_v32, %v1300_v61  ;;  %v2139_v2 = vpop.f32.mrb[6].mxu1  ;;  %2187 = vmatprep.mubr.msk.f32.mxu0 %vm1116_vm1, %v1479_v54  ;;  %v783_v61 = vrot.slane %v625_v1, %v2573_v11  ;;  %v644_v12 = vrot.slane %v630_v29, %v2566_v63 }
 0x178   : > { %v1315_v48 = vadd.f32 %v2139_v2, %v1091_v57  ;;  %v1309_v8 = vpop.f32.mrb[7].mxu1  ;;  %2188 = vmatmul.mubr.msk.f32.gmra.mrb[6].mxu0 %vm1116_vm1, %v1480_v49  ;;  %v1482_v16 = vmax.f32 %v1450_v4, 0.0  ;;  %v627_v4 = vcombine.high %v611_v47, %v611_v47  ;;  %v1096_v27 = vmul.f32 %v2458_v19, %v779_v41 }
 0x179   : > { %v1481_v9 = vmax.f32 %v1449_v62, 0.0  ;;  %v1310_v0 = vadd.f32 %v1309_v8, %v1090_v40  ;;  %v667_v40 = vrot.slane %v645_v39, %v2566_v63  ;;  %v653_v8 = vrot.slane %v637_v3, %v2566_v63 }
 0x17a   : > { %v1452_v22 = vadd.f32 %v2618_v32, %v1315_v48  ;;  %v1097_v48 = vmul.f32 %v2456_v18, %v783_v61  ;;  %v646_v1 = vcombine.high %v644_v12, %v644_v12  ;;  %v1099_v23 = vmul.f32 %v2466_v24, %v791_v13 }
 0x17b   : > { %v1451_v53 = vadd.f32 %v2618_v32, %v1310_v0  ;;  %v2142_v20 = vpop.f32.mrb[8].mxu1  ;;  %2190 = vmatprep.mubr.msk.f32.mxu0 %vm1116_vm1, %v1481_v9  ;;  %v799_v47 = vrot.slane %v667_v40, %v2573_v11  ;;  %v675_v39 = vcombine.high %v653_v8, %v653_v8 }
 0x17c   : > { %v1325_v34 = vadd.f32 %v2142_v20, %v1093_v17  ;;  %v1319_v35 = vpop.f32.mrb[9].mxu1  ;;  %2191 = vmatmul.mubr.msk.f32.gmra.mrb[8].mxu0 %vm1116_vm1, %v1482_v16  ;;  %v1484_v58 = vmax.f32 %v1452_v22, 0.0  ;;  %v787_v16 = vrot.slane %v627_v4, %v2573_v11  ;;  %v677_v20 = vcombine.high %v667_v40, %v667_v40 }
 0x17d   : > { %v1483_v6 = vmax.f32 %v1451_v53, 0.0  ;;  %v1320_v44 = vadd.f32 %v1319_v35, %v1092_v21  ;;  %v795_v35 = vrot.slane %v653_v8, %v2573_v11  ;;  %v1101_v7 = vmul.f32 %v2476_v30, %v799_v47 }
 0x17e   : > { %v1454_v54 = vadd.f32 %v2618_v32, %v1325_v34  ;;  %v1098_v34 = vmul.f32 %v2468_v25, %v787_v16  ;;  %v807_v24 = vrot.slane %v677_v20, %v2573_v11  ;;  %v803_v41 = vrot.slane %v675_v39, %v2573_v11 }
 0x17f   : > { %v1453_v33 = vadd.f32 %v2618_v32, %v1320_v44  ;;  %v2145_v49 = vpop.f32.mrb[10].mxu1  ;;  %2193 = vmatprep.mubr.msk.f32.mxu0 %vm1116_vm1, %v1483_v6  ;;  %v660_v4 = vrot.slane %v644_v12, %v2566_v63  ;;  %v724_v39 = vcombine.high %v2571_v10, %v2571_v10 }
 0x180   : > { %v1335_v57 = vadd.f32 %v2145_v49, %v1095_v45  ;;  %v1329_v59 = vpop.f32.mrb[11].mxu1  ;;  %2194 = vmatmul.mubr.msk.f32.gmra.mrb[10].mxu0 %vm1116_vm1, %v1484_v58  ;;  %v1486_v56 = vmax.f32 %v1454_v54, 0.0  ;;  %v1103_v30 = vmul.f32 %v2486_v36, %v807_v24 }
 0x181   : > { %v1485_v62 = vmax.f32 %v1453_v33, 0.0  ;;  %v1330_v2 = vadd.f32 %v1329_v59, %v1094_v15  ;;  %v674_v33 = vrot.slane %v646_v1, %v2566_v63  ;;  %v1100_v15 = vmul.f32 %v2478_v31, %v795_v35 }
 0x182   : > { %v1456_v14 = vadd.f32 %v2618_v32, %v1335_v57  ;;  %v1102_v63 = vmul.f32 %v2488_v37, %v803_v41  ;;  %v811_v12 = vrot.slane %v660_v4, %v2573_v11  ;;  %v676_v8 = vcombine.high %v660_v4, %v660_v4 }
 0x183   : > { %v1455_v9 = vadd.f32 %v2618_v32, %v1330_v2  ;;  %v2148_v0 = vpop.f32.mrb[12].mxu1  ;;  %2196 = vmatprep.mubr.msk.f32.mxu0 %vm1116_vm1, %v1485_v62 }
 0x184   : > { %v1345_v22 = vadd.f32 %v2148_v0, %v1097_v48  ;;  %v1339_v17 = vpop.f32.mrb[13].mxu1  ;;  %2197 = vmatmul.mubr.msk.f32.gmra.mrb[12].mxu0 %vm1116_vm1, %v1486_v56  ;;  %v1488_v21 = vmax.f32 %v1456_v14, 0.0  ;;  %v815_v14 = vrot.slane %v674_v33, %v2573_v11  ;;  %v678_v48 = vcombine.high %v674_v33, %v674_v33 }
 0x185   : > { %v1487_v53 = vmax.f32 %v1455_v9, 0.0  ;;  %v1340_v18 = vadd.f32 %v1339_v17, %v1096_v27  ;;  %v1104_v37 = vmul.f32 %v2498_v43, %v811_v12  ;;  %v819_v20 = vrot.slane %v676_v8, %v2573_v11 }
 0x186   : > { %v1458_v3 = vadd.f32 %v2618_v32, %v1345_v22  ;;  %v1105_v17 = vmul.f32 %v2496_v42, %v815_v14  ;;  %v823_v1 = vrot.slane %v678_v48, %v2573_v11 }
 0x187   : > { %v1457_v29 = vadd.f32 %v2618_v32, %v1340_v18  ;;  %v2151_v19 = vpop.f32.mrb[14].mxu1  ;;  %2199 = vmatprep.mubr.msk.f32.mxu0 %vm1116_vm1, %v1487_v53  ;;  %v1106_v43 = vmul.f32 %v2508_v51, %v819_v20 }
 0x188   : > { %v1355_v6 = vadd.f32 %v2151_v19, %v1099_v23  ;;  %v1349_v44 = vpop.f32.mrb[15].mxu1  ;;  %2200 = vmatmul.mubr.msk.f32.gmra.mrb[14].mxu0 %vm1116_vm1, %v1488_v21  ;;  %v1490_v54 = vmax.f32 %v1458_v3, 0.0  ;;  %v1107_v19 = vmul.f32 %v2506_v50, %v823_v1 }
 0x189   : > { %v1489_v45 = vmax.f32 %v1457_v29, 0.0  ;;  %v1350_v58 = vadd.f32 %v1349_v44, %v1098_v34 }
 0x18a   : > { %v1460_v61 = vadd.f32 %v2618_v32, %v1355_v6 }
 0x18b   : > { %v1459_v25 = vadd.f32 %v2618_v32, %v1350_v58  ;;  %v2154_v49 = vpop.f32.mrb[16].mxu1  ;;  %2202 = vmatprep.mubr.msk.f32.mxu0 %vm1116_vm1, %v1489_v45 }
 0x18c   : > { %v1365_v57 = vadd.f32 %v2154_v49, %v1101_v7  ;;  %v1359_v59 = vpop.f32.mrb[17].mxu1  ;;  %2203 = vmatmul.mubr.msk.f32.gmra.mrb[16].mxu0 %vm1116_vm1, %v1490_v54  ;;  %v1492_v40 = vmax.f32 %v1460_v61, 0.0  ;;  %v835_v7 = vrot.slane %v724_v39, %v2573_v11 }
 0x18d   : > { %v1491_v62 = vmax.f32 %v1459_v25, 0.0  ;;  %v1360_v2 = vadd.f32 %v1359_v59, %v1100_v15 }
 0x18e   : > { %v1462_v56 = vadd.f32 %v2618_v32, %v1365_v57  ;;  %v1110_v57 = vmul.f32 %v2528_v5, %v835_v7 }
 0x18f   : > { %v1461_v31 = vadd.f32 %v2618_v32, %v1360_v2  ;;  %v2157_v13 = vpop.f32.mrb[18].mxu1  ;;  %2205 = vmatprep.mubr.msk.f32.mxu0 %vm1116_vm1, %v1491_v62 }
 0x190   : > { %v1375_v9 = vadd.f32 %v2157_v13, %v1103_v30  ;;  %v1369_v0 = vpop.f32.mrb[19].mxu1  ;;  %2206 = vmatmul.mubr.msk.f32.gmra.mrb[18].mxu0 %vm1116_vm1, %v1492_v40  ;;  %v1494_v16 = vmax.f32 %v1462_v56, 0.0 }
 0x191   : > { %v1493_v36 = vmax.f32 %v1461_v31, 0.0  ;;  %v1370_v27 = vadd.f32 %v1369_v0, %v1102_v63 }
 0x192   : > { %v1464_v22 = vadd.f32 %v2618_v32, %v1375_v9 }
 0x193   : > { %v1463_v53 = vadd.f32 %v2618_v32, %v1370_v27  ;;  %v2160_v18 = vpop.f32.mrb[20].mxu1  ;;  %2208 = vmatprep.mubr.msk.f32.mxu0 %vm1116_vm1, %v1493_v36 }
 0x194   : > { %v1385_v21 = vadd.f32 %v2160_v18, %v1105_v17  ;;  %v1379_v3 = vpop.f32.mrb[21].mxu1  ;;  %2209 = vmatmul.mubr.msk.f32.gmra.mrb[20].mxu0 %vm1116_vm1, %v1494_v16  ;;  %v1496_v29 = vmax.f32 %v1464_v22, 0.0 }
 0x195   : > { %v1495_v23 = vmax.f32 %v1463_v53, 0.0  ;;  %v1380_v47 = vadd.f32 %v1379_v3, %v1104_v37 }
 0x196   : > { %v1466_v42 = vadd.f32 %v2618_v32, %v1385_v21 }
 0x197   : > { %v1465_v34 = vadd.f32 %v2618_v32, %v1380_v47  ;;  %v2163_v35 = vpop.f32.mrb[22].mxu1  ;;  %2211 = vmatprep.mubr.msk.f32.mxu0 %vm1116_vm1, %v1495_v23 }
 0x198   : > { %v1395_v6 = vadd.f32 %v2163_v35, %v1107_v19  ;;  %v1389_v44 = vpop.f32.mrb[23].mxu1  ;;  %2212 = vmatmul.mubr.msk.f32.gmra.mrb[22].mxu0 %vm1116_vm1, %v1496_v29  ;;  %v1498_v24 = vmax.f32 %v1466_v42, 0.0 }
 0x199   : > { %v1497_v45 = vmax.f32 %v1465_v34, 0.0  ;;  %v1390_v58 = vadd.f32 %v1389_v44, %v1106_v43 }
 0x19a   : > { %v1468_v54 = vadd.f32 %v2618_v32, %v1395_v6 }
 0x19b   : > { %v1467_v50 = vadd.f32 %v2618_v32, %v1390_v58  ;;  %v2166_v61 = vpop.f32.mrb[24].mxu1  ;;  %2214 = vmatprep.mubr.msk.f32.mxu0 %vm1116_vm1, %v1497_v45 }
 0x19c   : > { %v1405_v51 = vadd.f32 %v2166_v61, %v2580_v26  ;;  %v1399_v33 = vpop.f32.mrb[25].mxu1  ;;  %2215 = vmatmul.mubr.msk.f32.gmra.mrb[24].mxu0 %vm1116_vm1, %v1498_v24  ;;  %v1500_v49 = vmax.f32 %v1468_v54, 0.0 }
 0x19d   : > { %v1499_v10 = vmax.f32 %v1467_v50, 0.0  ;;  %v1400_v25 = vadd.f32 %v1399_v33, %v2583_v28 }
 0x19e   : > { %v1470_v15 = vadd.f32 %v2618_v32, %v1405_v51 }
 0x19f   : > { %v1469_v41 = vadd.f32 %v2618_v32, %v1400_v25  ;;  %v2169_v4 = vpop.f32.mrb[26].mxu1  ;;  %2217 = vmatprep.mubr.msk.f32.mxu0 %vm1116_vm1, %v1499_v10 }
 0x1a0   : > { %v1415_v11 = vadd.f32 %v2169_v4, %v2589_v38  ;;  %v1409_v59 = vpop.f32.mrb[27].mxu1  ;;  %2218 = vmatmul.mubr.msk.f32.gmra.mrb[26].mxu0 %vm1116_vm1, %v1500_v49  ;;  %v1502_v2 = vmax.f32 %v1470_v15, 0.0 }
 0x1a1   : > { %v1501_v26 = vmax.f32 %v1469_v41, 0.0  ;;  %v1410_v62 = vadd.f32 %v1409_v59, %v1110_v57 }
 0x1a2   : > { %v1472_v28 = vadd.f32 %v2618_v32, %v1415_v11 }
 0x1a3   : > { %v1471_v30 = vadd.f32 %v2618_v32, %v1410_v62  ;;  %v2172_v40 = vpop.f32.mrb[28].mxu1  ;;  %2220 = vmatprep.mubr.msk.f32.mxu0 %vm1116_vm1, %v1501_v26 }
 0x1a4   : > { %v1425_v56 = vadd.f32 %v2172_v40, %v2593_v60  ;;  %v1419_v14 = vpop.f32.mrb[29].mxu1  ;;  %2221 = vmatmul.mubr.msk.f32.gmra.mrb[28].mxu0 %vm1116_vm1, %v1502_v2  ;;  %v1504_v48 = vmax.f32 %v1472_v28, 0.0 }
 0x1a5   : > { %v1503_v5 = vmax.f32 %v1471_v30, 0.0  ;;  %v1420_v38 = vadd.f32 %v1419_v14, %v2596_v46 }
 0x1a6   : > { %v1474_v31 = vadd.f32 %v2618_v32, %v1425_v56 }
 0x1a7   : > { %v1473_v13 = vadd.f32 %v2618_v32, %v1420_v38  ;;  %v2175_v63 = vpop.f32.mrb[30].mxu1  ;;  %2223 = vmatprep.mubr.msk.f32.mxu0 %vm1116_vm1, %v1503_v5 }
 0x1a8   : > { %v1435_v12 = vadd.f32 %v2175_v63, %v2599_v52  ;;  %v1429_v8 = vpop.f32.mrb[31].mxu1  ;;  %2224 = vmatmul.mubr.msk.f32.gmra.mrb[30].mxu0 %vm1116_vm1, %v1504_v48  ;;  %v1506_v0 = vmax.f32 %v1474_v31, 0.0 }
 0x1a9   : > { %v1505_v60 = vmax.f32 %v1473_v13, 0.0  ;;  %v1430_v9 = vadd.f32 %v1429_v8, %v2601_v55 }
 0x1aa   : > { %v1476_v46 = vadd.f32 %v2618_v32, %v1435_v12 }
 0x1ab   : > { %v1475_v36 = vadd.f32 %v2618_v32, %v1430_v9  ;;  %2226 = vmatprep.mubr.msk.f32.mxu0 %vm1116_vm1, %v1505_v60 }
 0x1ac   : > { %2227 = vmatmul.mubr.msk.f32.gmra.mrb[32].mxu0 %vm1116_vm1, %v1506_v0  ;;  %v1508_v16 = vmax.f32 %v1476_v46, 0.0 }
 0x1ad   : > { %v1507_v27 = vmax.f32 %v1475_v36, 0.0 }
 0x1af   : > { %2229 = vmatprep.mubr.msk.f32.mxu0 %vm1116_vm1, %v1507_v27 }
 0x1b0   : > { %2230 = vmatmul.mubr.msk.f32.gmra.mrb[34].mxu0 %vm1116_vm1, %v1508_v16 }
 0x247   : > { %v2186_v52 = vpop.f32.mrb[4].mxu0 }
 0x248   : > { %v1681_v55 = vadd.f32 1.0, %v2186_v52  ;;  %v1675_v32 = vpop.f32.mrb[5].mxu0 }
 0x249   : > { %v1676_v22 = vadd.f32 1.0, %v1675_v32 }
 0x24a   : > { %1836 = vst.msk [vmem:[%s2757_s26 + $0x8] sm:$0xff] %vm1834_vm2, %v1681_v55 }
 0x24b   : > { %1835 = vst.msk [vmem:[%s2757_s26] sm:$0xff] %vm1834_vm2, %v1676_v22  ;;  %v2189_v17 = vpop.f32.mrb[6].mxu0 }
 0x24c   : > { %v1691_v1 = vadd.f32 1.0, %v2189_v17  ;;  %v1685_v53 = vpop.f32.mrb[7].mxu0 }
 0x24d   : > { %v1686_v18 = vadd.f32 1.0, %v1685_v53 }
 0x24e   : > { %1838 = vst.msk [vmem:[%s2757_s26 + $0x18] sm:$0xff] %vm1834_vm2, %v1691_v1 }
 0x24f   : > { %1837 = vst.msk [vmem:[%s2757_s26 + $0x10] sm:$0xff] %vm1834_vm2, %v1686_v18  ;;  %v2192_v37 = vpop.f32.mrb[8].mxu0 }
 0x250   : > { %v1701_v20 = vadd.f32 1.0, %v2192_v37  ;;  %v1695_v21 = vpop.f32.mrb[9].mxu0 }
 0x251   : > { %v1696_v3 = vadd.f32 1.0, %v1695_v21 }
 0x252   : > { %1840 = vst.msk [vmem:[%s2757_s26 + $0x28] sm:$0xff] %vm1834_vm2, %v1701_v20 }
 0x253   : > { %1839 = vst.msk [vmem:[%s2757_s26 + $0x20] sm:$0xff] %vm1834_vm2, %v1696_v3  ;;  %v2195_v23 = vpop.f32.mrb[10].mxu0 }
 0x254   : > { %v1711_v47 = vadd.f32 1.0, %v2195_v23  ;;  %v1705_v29 = vpop.f32.mrb[11].mxu0 }
 0x255   : > { %v1706_v42 = vadd.f32 1.0, %v1705_v29 }
 0x256   : > { %1842 = vst.msk [vmem:[%s2757_s26 + $0x38] sm:$0xff] %vm1834_vm2, %v1711_v47 }
 0x257   : > { %1841 = vst.msk [vmem:[%s2757_s26 + $0x30] sm:$0xff] %vm1834_vm2, %v1706_v42  ;;  %v2198_v19 = vpop.f32.mrb[12].mxu0 }
 0x258   : > { %v1721_v34 = vadd.f32 1.0, %v2198_v19  ;;  %v1715_v35 = vpop.f32.mrb[13].mxu0 }
 0x259   : > { %v1716_v43 = vadd.f32 1.0, %v1715_v35 }
 0x25a   : > { %1844 = vst.msk [vmem:[%s2757_s26 + $0x48] sm:$0xff] %vm1834_vm2, %v1721_v34 }
 0x25b   : > { %1843 = vst.msk [vmem:[%s2757_s26 + $0x40] sm:$0xff] %vm1834_vm2, %v1716_v43  ;;  %v2201_v39 = vpop.f32.mrb[14].mxu0 }
 0x25c   : > { %v1731_v6 = vadd.f32 1.0, %v2201_v39  ;;  %v1725_v44 = vpop.f32.mrb[15].mxu0 }
 0x25d   : > { %v1726_v45 = vadd.f32 1.0, %v1725_v44 }
 0x25e   : > { %1846 = vst.msk [vmem:[%s2757_s26 + $0x58] sm:$0xff] %vm1834_vm2, %v1731_v6 }
 0x25f   : > { %1845 = vst.msk [vmem:[%s2757_s26 + $0x50] sm:$0xff] %vm1834_vm2, %v1726_v45  ;;  %v2204_v58 = vpop.f32.mrb[16].mxu0 }
 0x260   : > { %v1741_v24 = vadd.f32 1.0, %v2204_v58  ;;  %v1735_v54 = vpop.f32.mrb[17].mxu0 }
 0x261   : > { %v1736_v50 = vadd.f32 1.0, %v1735_v54 }
 0x262   : > { %1848 = vst.msk [vmem:[%s2757_s26 + $0x68] sm:$0xff] %vm1834_vm2, %v1741_v24 }
 0x263   : > { %1847 = vst.msk [vmem:[%s2757_s26 + $0x60] sm:$0xff] %vm1834_vm2, %v1736_v50  ;;  %v2207_v61 = vpop.f32.mrb[18].mxu0 }
 0x264   : > { %v1751_v7 = vadd.f32 1.0, %v2207_v61  ;;  %v1745_v51 = vpop.f32.mrb[19].mxu0 }
 0x265   : > { %v1746_v33 = vadd.f32 1.0, %v1745_v51 }
 0x266   : > { %1850 = vst.msk [vmem:[%s2757_s26 + $0x78] sm:$0xff] %vm1834_vm2, %v1751_v7 }
 0x267   : > { %1849 = vst.msk [vmem:[%s2757_s26 + $0x70] sm:$0xff] %vm1834_vm2, %v1746_v33  ;;  %v2210_v10 = vpop.f32.mrb[20].mxu0 }
 0x268   : > { %v1761_v25 = vadd.f32 1.0, %v2210_v10  ;;  %v1755_v49 = vpop.f32.mrb[21].mxu0 }
 0x269   : > { %v1756_v15 = vadd.f32 1.0, %v1755_v49 }
 0x26a   : > { %1852 = vst.msk [vmem:[%s2757_s26 + $0x88] sm:$0xff] %vm1834_vm2, %v1761_v25 }
 0x26b   : > { %1851 = vst.msk [vmem:[%s2757_s26 + $0x80] sm:$0xff] %vm1834_vm2, %v1756_v15  ;;  %v2213_v41 = vpop.f32.mrb[22].mxu0 }
 0x26c   : > { %v1771_v4 = vadd.f32 1.0, %v2213_v41  ;;  %v1765_v57 = vpop.f32.mrb[23].mxu0 }
 0x26d   : > { %v1766_v11 = vadd.f32 1.0, %v1765_v57 }
 0x26e   : > { %1854 = vst.msk [vmem:[%s2757_s26 + $0x98] sm:$0xff] %vm1834_vm2, %v1771_v4 }
 0x26f   : > { %1853 = vst.msk [vmem:[%s2757_s26 + $0x90] sm:$0xff] %vm1834_vm2, %v1766_v11  ;;  %v2216_v59 = vpop.f32.mrb[24].mxu0 }
 0x270   : > { %v1781_v26 = vadd.f32 1.0, %v2216_v59  ;;  %v1775_v62 = vpop.f32.mrb[25].mxu0 }
 0x271   : > { %v1776_v2 = vadd.f32 1.0, %v1775_v62 }
 0x272   : > { %1856 = vst.msk [vmem:[%s2757_s26 + $0xa8] sm:$0xff] %vm1834_vm2, %v1781_v26 }
 0x273   : > { %1855 = vst.msk [vmem:[%s2757_s26 + $0xa0] sm:$0xff] %vm1834_vm2, %v1776_v2  ;;  %v2219_v28 = vpop.f32.mrb[26].mxu0 }
 0x274   : > { %v1791_v30 = vadd.f32 1.0, %v2219_v28  ;;  %v1785_v40 = vpop.f32.mrb[27].mxu0 }
 0x275   : > { %v1786_v56 = vadd.f32 1.0, %v1785_v40 }
 0x276   : > { %1858 = vst.msk [vmem:[%s2757_s26 + $0xb8] sm:$0xff] %vm1834_vm2, %v1791_v30 }
 0x277   : > { %1857 = vst.msk [vmem:[%s2757_s26 + $0xb0] sm:$0xff] %vm1834_vm2, %v1786_v56  ;;  %v2222_v14 = vpop.f32.mrb[28].mxu0 }
 0x278   : > { %v1801_v5 = vadd.f32 1.0, %v2222_v14  ;;  %v1795_v38 = vpop.f32.mrb[29].mxu0 }
 0x279   : > { %v1796_v48 = vadd.f32 1.0, %v1795_v38 }
 0x27a   : > { %1860 = vst.msk [vmem:[%s2757_s26 + $0xc8] sm:$0xff] %vm1834_vm2, %v1801_v5 }
 0x27b   : > { %1859 = vst.msk [vmem:[%s2757_s26 + $0xc0] sm:$0xff] %vm1834_vm2, %v1796_v48  ;;  %v2225_v31 = vpop.f32.mrb[30].mxu0 }
 0x27c   : > { %v1811_v13 = vadd.f32 1.0, %v2225_v31  ;;  %v1805_v63 = vpop.f32.mrb[31].mxu0 }
 0x27d   : > { %v1806_v12 = vadd.f32 1.0, %v1805_v63 }
 0x27e   : > { %1862 = vst.msk [vmem:[%s2757_s26 + $0xd8] sm:$0xff] %vm1834_vm2, %v1811_v13 }
 0x27f   : > { %1861 = vst.msk [vmem:[%s2757_s26 + $0xd0] sm:$0xff] %vm1834_vm2, %v1806_v12  ;;  %v2228_v8 = vpop.f32.mrb[32].mxu0 }
 0x280   : > { %v1821_v60 = vadd.f32 1.0, %v2228_v8  ;;  %v1815_v9 = vpop.f32.mrb[33].mxu0 }
 0x281   : > { %v1816_v0 = vadd.f32 1.0, %v1815_v9 }
 0x282   : > { %1864 = vst.msk [vmem:[%s2757_s26 + $0xe8] sm:$0xff] %vm1834_vm2, %v1821_v60 }
 0x283   : > { %1863 = vst.msk [vmem:[%s2757_s26 + $0xe0] sm:$0xff] %vm1834_vm2, %v1816_v0  ;;  %v2231_v46 = vpop.f32.mrb[34].mxu0 }
 0x284   : > { %v1831_v36 = vadd.f32 1.0, %v2231_v46  ;;  %v1825_v27 = vpop.f32.mrb[35].mxu0 }
 0x285   : > { %v1826_v16 = vadd.f32 1.0, %v1825_v27 }
 0x286   : > { %1866 = vst.msk [vmem:[%s2757_s26 + $0xf8] sm:$0xff] %vm1834_vm2, %v1831_v36 }
 0x287   : > { %1865 = vst.msk [vmem:[%s2757_s26 + $0xf0] sm:$0xff] %vm1834_vm2, %v1826_v16 }
 0x288 PF: > { %s18_s27 = sadd.s32 1, %s2270_s27  }
 0x289   : > { %p15_p5 = scmp.ge.s32.totalorder %s18_s27, 4  }
 0x28b   :  { %17 = sbr.rel (!%p15_p5) target bundleno = 1 (0x1), region = 88 }

</bundles_post_ra>
